<compile_context>
chip_gen: v6e
topology: v6e:2x2x1
jax: 0.10.0
libtpu: 0.0.40
codegen_flags: <defaults>
</compile_context>

<pallas_src>
import math
import jax
import jax.numpy as jnp
import numpy as np
from jax.experimental import pallas as pl
from jax.experimental.pallas import tpu as pltpu

EPS = 1e-6  # LayerNorm eps (matches module default)


def _graph_module_kernel(
    x_ref,      # (rows, D)   f32   node features, batch-flattened (rows = tb*K)
    adj_ref,    # (tb, K, K)  f32   adjacency (cast / used in f32, no HBM copy)
    w1_ref,     # (D, H)  bf16   gc1 weight
    b1_ref,     # (1, H)  f32    gc1 bias
    w2_ref,     # (H, D)  bf16   gc2 weight
    b2_ref,     # (1, D)  f32    gc2 bias
    wf1_ref,    # (D, H)  bf16   ffn w_1 weight (stored as in x out)
    bf1_ref,    # (1, H)  f32
    wf2_ref,    # (H, D)  bf16   ffn w_2 weight
    bf2_ref,    # (1, D)  f32
    g_ref,      # (1, D)  f32    LayerNorm a_2
    beta_ref,   # (1, D)  f32    LayerNorm b_2
    out_ref,    # (rows, D) f32
):
    tb, k, _ = adj_ref.shape
    rows, d = x_ref.shape

    x = x_ref[...]            # (rows, D) f32
    adj = adj_ref[...]        # (tb, K, K) f32 (stays f32 on the VPU path)
    w_dt = w1_ref.dtype       # bf16 (MXU operand dtype)

    def adj_mix(s2d, h_dim):
        """out[b,k,:] = sum_j adj[b,k,j] * s[b,j,:]   (per-batch aggregation)."""
        # Reshape only splits/merges the second-minor dim (minor dim unchanged),
        # which is a supported, cheap relayout.
        s3 = s2d.reshape(tb, k, h_dim)                      # (tb, K, H) f32
        if k <= 16:
            # K broadcast-MACs on the VPU, full f32 (no bf16 roundtrip on s).
            out = adj[:, :, 0:1] * s3[:, 0:1, :]
            for j in range(1, k):
                out = out + adj[:, :, j:j + 1] * s3[:, j:j + 1, :]
        else:
            # Fallback for large K: batched MXU matmul (bf16 operands, f32 acc).
            out = jnp.einsum('bkj,bjh->bkh',
                             adj.astype(jnp.bfloat16), s3.astype(jnp.bfloat16),
                             preferred_element_type=jnp.float32)
        return out.reshape(rows, h_dim)

    # ---- GCN layer 1: relu(adj @ (x @ W1) + b1) ----
    s1 = jnp.dot(x.astype(w_dt), w1_ref[...],
                 preferred_element_type=jnp.float32)        # (rows, H) f32
    h1 = jnp.maximum(adj_mix(s1, s1.shape[-1]) + b1_ref[...], 0.0)
    # (dropout between gc1 and gc2 is identity in eval mode)

    # ---- GCN layer 2: adj @ (h1 @ W2) + b2 ----
    s2 = jnp.dot(h1.astype(w_dt), w2_ref[...],
                 preferred_element_type=jnp.float32)        # (rows, D) f32
    h2 = adj_mix(s2, d) + b2_ref[...]                       # (rows, D) f32

    # ---- LayerNorm (module style: unbiased std, eps added to std) ----
    mean = jnp.mean(h2, axis=-1, keepdims=True)
    centered = h2 - mean
    var_unbiased = jnp.sum(centered * centered, axis=-1, keepdims=True) / (d - 1)
    inv_std = pl.reciprocal(jnp.sqrt(var_unbiased) + EPS, approx=True)   # EUP
    ln = g_ref[...] * (centered * inv_std) + beta_ref[...]

    # ---- first residual ----
    g_feat = ln + x                                         # (rows, D) f32

    # ---- PositionwiseFeedForward: w2(relu(w1(g_feat))) (dropout = identity) ----
    f1 = jnp.maximum(jnp.dot(g_feat.astype(w_dt), wf1_ref[...],
                             preferred_element_type=jnp.float32) + bf1_ref[...], 0.0)
    f2 = jnp.dot(f1.astype(w_dt), wf2_ref[...],
                 preferred_element_type=jnp.float32) + bf2_ref[...]

    # ---- second residual ----
    out_ref[...] = f2 + g_feat


def _choose_tb(B, K, target_rows=512):
    """Batch tile.  tb must equal B (full-batch block) or be a multiple of 8
    (sublane-aligned (tb*K, D) blocks).  Targets ~512 MXU/DMA rows per step;
    splits into >=2 grid steps only when the batch is large enough (v7x megacore),
    since an extra grid step costs only ~0.35us elsewhere."""
    tb = max(1, target_rows // max(K, 1))
    if tb >= B:
        if B >= 16:
            return max(8, (B // 2) // 8 * 8)   # >=2 steps -> both v7x TensorCores
        return B                               # single full-batch block
    tb = (tb // 8) * 8
    return tb if tb >= 8 else B


def graph_module_forward(graph_nodes, graph, params):
    """Returns (adj, graph_encode_features), matching Graph_Module.forward."""
    B, K, D = graph_nodes.shape
    H = params["w1"].shape[1]
    adj = graph.astype(jnp.float32)          # returned, matches module semantics

    tb = _choose_tb(B, K)
    steps = pl.cdiv(B, tb)
    rows = tb * K

    # (B, K, D) -> (B*K, D) is a contiguous (free) reshape; no extra HBM pass.
    x2d = graph_nodes.astype(jnp.float32).reshape(B * K, D)

    bf = lambda w: w.astype(jnp.bfloat16)    # tiny, grid-invariant weights
    full2d = lambda shape: pl.BlockSpec(shape, lambda b: (0, 0))

    # Advisory cost estimate for XLA scheduling around the custom call.
    proc_b = int(steps) * tb
    flops = int(8 * proc_b * K * D * H            # 4 node/FFN matmuls
                + 2 * proc_b * K * K * (H + D))   # adjacency aggregation
    transcendentals = int(2 * proc_b * K)
    bytes_accessed = int(
        proc_b * K * D * 4            # x (f32)
        + proc_b * K * K * 4          # adj (f32)
        + B * K * D * 4               # out (f32)
        + 8 * D * H                   # 4 bf16 weight matrices
        + (2 * H + 4 * D) * 4)        # biases + layernorm params

    out2d = pl.pallas_call(
        _graph_module_kernel,
        out_shape=jax.ShapeDtypeStruct((B * K, D), jnp.float32),
        grid_spec=pltpu.PrefetchScalarGridSpec(
            num_scalar_prefetch=0,
            grid=(steps,),
            in_specs=[
                pl.BlockSpec((rows, D), lambda b: (b, 0)),      # x (flattened)
                pl.BlockSpec((tb, K, K), lambda b: (b, 0, 0)),  # adj (f32)
                full2d((D, H)), full2d((1, H)),                 # gc1 W, b
                full2d((H, D)), full2d((1, D)),                 # gc2 W, b
                full2d((D, H)), full2d((1, H)),                 # ffn w1 W, b
                full2d((H, D)), full2d((1, D)),                 # ffn w2 W, b
                full2d((1, D)), full2d((1, D)),                 # layernorm a_2, b_2
            ],
            out_specs=pl.BlockSpec((rows, D), lambda b: (b, 0)),
        ),
        compiler_params=pltpu.CompilerParams(
            dimension_semantics=("parallel",),
            vmem_limit_bytes=48 * 1024 * 1024),
        cost_estimate=pl.CostEstimate(
            flops=flops, transcendentals=transcendentals,
            bytes_accessed=bytes_accessed),
    )(
        x2d, adj,
        bf(params["w1"]), params["b1"], bf(params["w2"]), params["b2"],
        bf(params["wf1"]), params["bf1"], bf(params["wf2"]), params["bf2"],
        params["ln_a"], params["ln_b"],
    )
    return adj, out2d.reshape(B, K, D)


def init_params(key, indim, hiddim, outdim):
    """Deterministic parameter init mirroring the module's shapes/init ranges."""
    assert indim == outdim, "residual connections require indim == outdim"
    ks = jax.random.split(key, 8)
    u = lambda k, shape, s: jax.random.uniform(k, shape, jnp.float32, -s, s)

    # GraphConvolution init: uniform(-1/sqrt(out_features), 1/sqrt(out_features))
    s1 = 1.0 / math.sqrt(hiddim)
    s2 = 1.0 / math.sqrt(outdim)
    # nn.Linear default init: uniform(-1/sqrt(in_features), 1/sqrt(in_features))
    sf1 = 1.0 / math.sqrt(indim)
    sf2 = 1.0 / math.sqrt(hiddim)

    return {
        "w1": u(ks[0], (indim, hiddim), s1),
        "b1": u(ks[1], (1, hiddim), s1),
        "w2": u(ks[2], (hiddim, outdim), s2),
        "b2": u(ks[3], (1, outdim), s2),
        "wf1": u(ks[4], (indim, hiddim), sf1),   # stored as (in, out)
        "bf1": u(ks[5], (1, hiddim), sf1),
        "wf2": u(ks[6], (hiddim, outdim), sf2),
        "bf2": u(ks[7], (1, outdim), sf2),
        "ln_a": jnp.ones((1, outdim), jnp.float32),
        "ln_b": jnp.zeros((1, outdim), jnp.float32),
    }


def _reference(graph_nodes, graph, params):
    """Pure-JAX f32 reference of Graph_Module.forward (eval mode)."""
    adj = graph.astype(jnp.float32)
    x = graph_nodes.astype(jnp.float32)
    h1 = jnp.maximum(adj @ (x @ params["w1"]) + params["b1"][0], 0.0)
    h2 = adj @ (h1 @ params["w2"]) + params["b2"][0]
    d = h2.shape[-1]
    mean = jnp.mean(h2, axis=-1, keepdims=True)
    c = h2 - mean
    std = jnp.sqrt(jnp.sum(c * c, axis=-1, keepdims=True) / (d - 1))
    ln = params["ln_a"][0] * c / (std + EPS) + params["ln_b"][0]
    g = ln + x
    f = jnp.maximum(g @ params["wf1"] + params["bf1"][0], 0.0)
    f = f @ params["wf2"] + params["bf2"][0]
    return adj, f + g


def _run_case(B, K, indim, hiddim, outdim, seed):
    key = jax.random.PRNGKey(seed)
    k_x, k_a, k_p = jax.random.split(key, 3)

    graph_nodes = jax.random.normal(k_x, (B, K, indim), jnp.float32)
    # symmetric-ish "adjacency" (the module just uses graph.float() directly)
    a = jax.random.uniform(k_a, (B, K, K), jnp.float32)
    graph = 0.5 * (a + jnp.swapaxes(a, 1, 2))

    params = init_params(k_p, indim, hiddim, outdim)

    adj_out, feats = graph_module_forward(graph_nodes, graph, params)
    feats = jax.block_until_ready(feats)

    _, ref_feats = _reference(graph_nodes, graph, params)
    # bf16 MXU operands + approx reciprocal -> loose tolerance (inference use).
    np.testing.assert_allclose(np.asarray(feats), np.asarray(ref_feats),
                               rtol=5e-2, atol=5e-2)
    np.testing.assert_allclose(np.asarray(adj_out), np.asarray(graph),
                               rtol=1e-6, atol=1e-6)


if __name__ == "__main__":
    indim, hiddim, outdim = 16, 32, 16
    # Case 1: small batch -> single full-batch block (grid = 1).
    _run_case(B=4, K=8, indim=indim, hiddim=hiddim, outdim=outdim, seed=0)
    # Case 2: larger batch -> tb=8, 3 grid steps, ragged last block (partial
    # input/output blocks, no wrapper padding).
    _run_case(B=20, K=8, indim=indim, hiddim=hiddim, outdim=outdim, seed=0)

    print("KERNEL_OK")
</pallas_src>

<mosaic_0001>
module attributes {stable_mosaic.version = 11 : i64} {
  func.func @_graph_module_kernel(%arg0: i32, %arg1: memref<32x16xf32, #tpu.memory_space<vmem>>, %arg2: memref<4x8x8xf32, #tpu.memory_space<vmem>>, %arg3: memref<16x32xbf16, #tpu.memory_space<vmem>>, %arg4: memref<1x32xf32, #tpu.memory_space<vmem>>, %arg5: memref<32x16xbf16, #tpu.memory_space<vmem>>, %arg6: memref<1x16xf32, #tpu.memory_space<vmem>>, %arg7: memref<16x32xbf16, #tpu.memory_space<vmem>>, %arg8: memref<1x32xf32, #tpu.memory_space<vmem>>, %arg9: memref<32x16xbf16, #tpu.memory_space<vmem>>, %arg10: memref<1x16xf32, #tpu.memory_space<vmem>>, %arg11: memref<1x16xf32, #tpu.memory_space<vmem>>, %arg12: memref<1x16xf32, #tpu.memory_space<vmem>>, %arg13: memref<32x16xf32, #tpu.memory_space<vmem>>) attributes {dimension_semantics = [#tpu.dimension_semantics<parallel>], iteration_bounds = array<i64: 1>, scalar_prefetch = 0 : i64, scratch_operands = 0 : i64, tpu.core_type = #tpu.core_type<tc>, window_params = [{transform_indices = @transform_0, window_bounds = array<i64: 32, 16>}, {transform_indices = @transform_1, window_bounds = array<i64: 4, 8, 8>}, {pipeline_mode = #tpu.pipeline_mode<synchronous>, transform_indices = @transform_2, window_bounds = array<i64: 16, 32>}, {pipeline_mode = #tpu.pipeline_mode<synchronous>, transform_indices = @transform_3, window_bounds = array<i64: 1, 32>}, {pipeline_mode = #tpu.pipeline_mode<synchronous>, transform_indices = @transform_4, window_bounds = array<i64: 32, 16>}, {pipeline_mode = #tpu.pipeline_mode<synchronous>, transform_indices = @transform_5, window_bounds = array<i64: 1, 16>}, {pipeline_mode = #tpu.pipeline_mode<synchronous>, transform_indices = @transform_6, window_bounds = array<i64: 16, 32>}, {pipeline_mode = #tpu.pipeline_mode<synchronous>, transform_indices = @transform_7, window_bounds = array<i64: 1, 32>}, {pipeline_mode = #tpu.pipeline_mode<synchronous>, transform_indices = @transform_8, window_bounds = array<i64: 32, 16>}, {pipeline_mode = #tpu.pipeline_mode<synchronous>, transform_indices = @transform_9, window_bounds = array<i64: 1, 16>}, {pipeline_mode = #tpu.pipeline_mode<synchronous>, transform_indices = @transform_10, window_bounds = array<i64: 1, 16>}, {pipeline_mode = #tpu.pipeline_mode<synchronous>, transform_indices = @transform_11, window_bounds = array<i64: 1, 16>}, {transform_indices = @transform_12, window_bounds = array<i64: 32, 16>}]} {
    %c0 = arith.constant 0 : index
    %c0_0 = arith.constant 0 : index
    %0 = vector.load %arg1[%c0, %c0_0] : memref<32x16xf32, #tpu.memory_space<vmem>>, vector<32x16xf32>
    %c0_1 = arith.constant 0 : index
    %c0_2 = arith.constant 0 : index
    %c0_3 = arith.constant 0 : index
    %1 = vector.load %arg2[%c0_1, %c0_2, %c0_3] : memref<4x8x8xf32, #tpu.memory_space<vmem>>, vector<4x8x8xf32>
    %2 = arith.truncf %0 : vector<32x16xf32> to vector<32x16xbf16>
    %c0_4 = arith.constant 0 : index
    %c0_5 = arith.constant 0 : index
    %3 = vector.load %arg3[%c0_4, %c0_5] : memref<16x32xbf16, #tpu.memory_space<vmem>>, vector<16x32xbf16>
    %cst = arith.constant dense<0.000000e+00> : vector<32x32xf32>
    %4 = tpu.matmul %2, %3, %cst {dimension_numbers = #tpu.dot_dimension_numbers<[1], [0], [0], [1], [0, 0, 1, 1], [], []>} : vector<32x16xbf16>, vector<16x32xbf16>, vector<32x32xf32> -> vector<32x32xf32>
    %5 = vector.shape_cast %4 : vector<32x32xf32> to vector<4x8x32xf32>
    %6 = vector.extract_strided_slice %1 {offsets = [0, 0, 0], sizes = [4, 8, 1], strides = [1, 1, 1]} : vector<4x8x8xf32> to vector<4x8x1xf32>
    %7 = vector.extract_strided_slice %5 {offsets = [0, 0, 0], sizes = [4, 1, 32], strides = [1, 1, 1]} : vector<4x8x32xf32> to vector<4x1x32xf32>
    %8 = vector.broadcast %6 : vector<4x8x1xf32> to vector<4x8x32xf32>
    %9 = vector.broadcast %7 : vector<4x1x32xf32> to vector<4x8x32xf32>
    %10 = arith.mulf %8, %9 : vector<4x8x32xf32>
    %11 = vector.extract_strided_slice %1 {offsets = [0, 0, 1], sizes = [4, 8, 1], strides = [1, 1, 1]} : vector<4x8x8xf32> to vector<4x8x1xf32>
    %12 = vector.extract_strided_slice %5 {offsets = [0, 1, 0], sizes = [4, 1, 32], strides = [1, 1, 1]} : vector<4x8x32xf32> to vector<4x1x32xf32>
    %13 = vector.broadcast %11 : vector<4x8x1xf32> to vector<4x8x32xf32>
    %14 = vector.broadcast %12 : vector<4x1x32xf32> to vector<4x8x32xf32>
    %15 = arith.mulf %13, %14 : vector<4x8x32xf32>
    %16 = arith.addf %10, %15 : vector<4x8x32xf32>
    %17 = vector.extract_strided_slice %1 {offsets = [0, 0, 2], sizes = [4, 8, 1], strides = [1, 1, 1]} : vector<4x8x8xf32> to vector<4x8x1xf32>
    %18 = vector.extract_strided_slice %5 {offsets = [0, 2, 0], sizes = [4, 1, 32], strides = [1, 1, 1]} : vector<4x8x32xf32> to vector<4x1x32xf32>
    %19 = vector.broadcast %17 : vector<4x8x1xf32> to vector<4x8x32xf32>
    %20 = vector.broadcast %18 : vector<4x1x32xf32> to vector<4x8x32xf32>
    %21 = arith.mulf %19, %20 : vector<4x8x32xf32>
    %22 = arith.addf %16, %21 : vector<4x8x32xf32>
    %23 = vector.extract_strided_slice %1 {offsets = [0, 0, 3], sizes = [4, 8, 1], strides = [1, 1, 1]} : vector<4x8x8xf32> to vector<4x8x1xf32>
    %24 = vector.extract_strided_slice %5 {offsets = [0, 3, 0], sizes = [4, 1, 32], strides = [1, 1, 1]} : vector<4x8x32xf32> to vector<4x1x32xf32>
    %25 = vector.broadcast %23 : vector<4x8x1xf32> to vector<4x8x32xf32>
    %26 = vector.broadcast %24 : vector<4x1x32xf32> to vector<4x8x32xf32>
    %27 = arith.mulf %25, %26 : vector<4x8x32xf32>
    %28 = arith.addf %22, %27 : vector<4x8x32xf32>
    %29 = vector.extract_strided_slice %1 {offsets = [0, 0, 4], sizes = [4, 8, 1], strides = [1, 1, 1]} : vector<4x8x8xf32> to vector<4x8x1xf32>
    %30 = vector.extract_strided_slice %5 {offsets = [0, 4, 0], sizes = [4, 1, 32], strides = [1, 1, 1]} : vector<4x8x32xf32> to vector<4x1x32xf32>
    %31 = vector.broadcast %29 : vector<4x8x1xf32> to vector<4x8x32xf32>
    %32 = vector.broadcast %30 : vector<4x1x32xf32> to vector<4x8x32xf32>
    %33 = arith.mulf %31, %32 : vector<4x8x32xf32>
    %34 = arith.addf %28, %33 : vector<4x8x32xf32>
    %35 = vector.extract_strided_slice %1 {offsets = [0, 0, 5], sizes = [4, 8, 1], strides = [1, 1, 1]} : vector<4x8x8xf32> to vector<4x8x1xf32>
    %36 = vector.extract_strided_slice %5 {offsets = [0, 5, 0], sizes = [4, 1, 32], strides = [1, 1, 1]} : vector<4x8x32xf32> to vector<4x1x32xf32>
    %37 = vector.broadcast %35 : vector<4x8x1xf32> to vector<4x8x32xf32>
    %38 = vector.broadcast %36 : vector<4x1x32xf32> to vector<4x8x32xf32>
    %39 = arith.mulf %37, %38 : vector<4x8x32xf32>
    %40 = arith.addf %34, %39 : vector<4x8x32xf32>
    %41 = vector.extract_strided_slice %1 {offsets = [0, 0, 6], sizes = [4, 8, 1], strides = [1, 1, 1]} : vector<4x8x8xf32> to vector<4x8x1xf32>
    %42 = vector.extract_strided_slice %5 {offsets = [0, 6, 0], sizes = [4, 1, 32], strides = [1, 1, 1]} : vector<4x8x32xf32> to vector<4x1x32xf32>
    %43 = vector.broadcast %41 : vector<4x8x1xf32> to vector<4x8x32xf32>
    %44 = vector.broadcast %42 : vector<4x1x32xf32> to vector<4x8x32xf32>
    %45 = arith.mulf %43, %44 : vector<4x8x32xf32>
    %46 = arith.addf %40, %45 : vector<4x8x32xf32>
    %47 = vector.extract_strided_slice %1 {offsets = [0, 0, 7], sizes = [4, 8, 1], strides = [1, 1, 1]} : vector<4x8x8xf32> to vector<4x8x1xf32>
    %48 = vector.extract_strided_slice %5 {offsets = [0, 7, 0], sizes = [4, 1, 32], strides = [1, 1, 1]} : vector<4x8x32xf32> to vector<4x1x32xf32>
    %49 = vector.broadcast %47 : vector<4x8x1xf32> to vector<4x8x32xf32>
    %50 = vector.broadcast %48 : vector<4x1x32xf32> to vector<4x8x32xf32>
    %51 = arith.mulf %49, %50 : vector<4x8x32xf32>
    %52 = arith.addf %46, %51 : vector<4x8x32xf32>
    %53 = vector.shape_cast %52 : vector<4x8x32xf32> to vector<32x32xf32>
    %c0_6 = arith.constant 0 : index
    %c0_7 = arith.constant 0 : index
    %54 = vector.load %arg4[%c0_6, %c0_7] : memref<1x32xf32, #tpu.memory_space<vmem>>, vector<1x32xf32>
    %55 = vector.broadcast %54 : vector<1x32xf32> to vector<32x32xf32>
    %56 = arith.addf %53, %55 : vector<32x32xf32>
    %cst_8 = arith.constant 0.000000e+00 : f32
    %57 = vector.broadcast %cst_8 : f32 to vector<32x32xf32>
    %58 = arith.maximumf %56, %57 : vector<32x32xf32>
    %59 = arith.truncf %58 : vector<32x32xf32> to vector<32x32xbf16>
    %c0_9 = arith.constant 0 : index
    %c0_10 = arith.constant 0 : index
    %60 = vector.load %arg5[%c0_9, %c0_10] : memref<32x16xbf16, #tpu.memory_space<vmem>>, vector<32x16xbf16>
    %cst_11 = arith.constant dense<0.000000e+00> : vector<32x16xf32>
    %61 = tpu.matmul %59, %60, %cst_11 {dimension_numbers = #tpu.dot_dimension_numbers<[1], [0], [0], [1], [0, 0, 1, 1], [], []>} : vector<32x32xbf16>, vector<32x16xbf16>, vector<32x16xf32> -> vector<32x16xf32>
    %62 = vector.shape_cast %61 : vector<32x16xf32> to vector<4x8x16xf32>
    %63 = vector.extract_strided_slice %1 {offsets = [0, 0, 0], sizes = [4, 8, 1], strides = [1, 1, 1]} : vector<4x8x8xf32> to vector<4x8x1xf32>
    %64 = vector.extract_strided_slice %62 {offsets = [0, 0, 0], sizes = [4, 1, 16], strides = [1, 1, 1]} : vector<4x8x16xf32> to vector<4x1x16xf32>
    %65 = vector.broadcast %63 : vector<4x8x1xf32> to vector<4x8x16xf32>
    %66 = vector.broadcast %64 : vector<4x1x16xf32> to vector<4x8x16xf32>
    %67 = arith.mulf %65, %66 : vector<4x8x16xf32>
    %68 = vector.extract_strided_slice %1 {offsets = [0, 0, 1], sizes = [4, 8, 1], strides = [1, 1, 1]} : vector<4x8x8xf32> to vector<4x8x1xf32>
    %69 = vector.extract_strided_slice %62 {offsets = [0, 1, 0], sizes = [4, 1, 16], strides = [1, 1, 1]} : vector<4x8x16xf32> to vector<4x1x16xf32>
    %70 = vector.broadcast %68 : vector<4x8x1xf32> to vector<4x8x16xf32>
    %71 = vector.broadcast %69 : vector<4x1x16xf32> to vector<4x8x16xf32>
    %72 = arith.mulf %70, %71 : vector<4x8x16xf32>
    %73 = arith.addf %67, %72 : vector<4x8x16xf32>
    %74 = vector.extract_strided_slice %1 {offsets = [0, 0, 2], sizes = [4, 8, 1], strides = [1, 1, 1]} : vector<4x8x8xf32> to vector<4x8x1xf32>
    %75 = vector.extract_strided_slice %62 {offsets = [0, 2, 0], sizes = [4, 1, 16], strides = [1, 1, 1]} : vector<4x8x16xf32> to vector<4x1x16xf32>
    %76 = vector.broadcast %74 : vector<4x8x1xf32> to vector<4x8x16xf32>
    %77 = vector.broadcast %75 : vector<4x1x16xf32> to vector<4x8x16xf32>
    %78 = arith.mulf %76, %77 : vector<4x8x16xf32>
    %79 = arith.addf %73, %78 : vector<4x8x16xf32>
    %80 = vector.extract_strided_slice %1 {offsets = [0, 0, 3], sizes = [4, 8, 1], strides = [1, 1, 1]} : vector<4x8x8xf32> to vector<4x8x1xf32>
    %81 = vector.extract_strided_slice %62 {offsets = [0, 3, 0], sizes = [4, 1, 16], strides = [1, 1, 1]} : vector<4x8x16xf32> to vector<4x1x16xf32>
    %82 = vector.broadcast %80 : vector<4x8x1xf32> to vector<4x8x16xf32>
    %83 = vector.broadcast %81 : vector<4x1x16xf32> to vector<4x8x16xf32>
    %84 = arith.mulf %82, %83 : vector<4x8x16xf32>
    %85 = arith.addf %79, %84 : vector<4x8x16xf32>
    %86 = vector.extract_strided_slice %1 {offsets = [0, 0, 4], sizes = [4, 8, 1], strides = [1, 1, 1]} : vector<4x8x8xf32> to vector<4x8x1xf32>
    %87 = vector.extract_strided_slice %62 {offsets = [0, 4, 0], sizes = [4, 1, 16], strides = [1, 1, 1]} : vector<4x8x16xf32> to vector<4x1x16xf32>
    %88 = vector.broadcast %86 : vector<4x8x1xf32> to vector<4x8x16xf32>
    %89 = vector.broadcast %87 : vector<4x1x16xf32> to vector<4x8x16xf32>
    %90 = arith.mulf %88, %89 : vector<4x8x16xf32>
    %91 = arith.addf %85, %90 : vector<4x8x16xf32>
    %92 = vector.extract_strided_slice %1 {offsets = [0, 0, 5], sizes = [4, 8, 1], strides = [1, 1, 1]} : vector<4x8x8xf32> to vector<4x8x1xf32>
    %93 = vector.extract_strided_slice %62 {offsets = [0, 5, 0], sizes = [4, 1, 16], strides = [1, 1, 1]} : vector<4x8x16xf32> to vector<4x1x16xf32>
    %94 = vector.broadcast %92 : vector<4x8x1xf32> to vector<4x8x16xf32>
    %95 = vector.broadcast %93 : vector<4x1x16xf32> to vector<4x8x16xf32>
    %96 = arith.mulf %94, %95 : vector<4x8x16xf32>
    %97 = arith.addf %91, %96 : vector<4x8x16xf32>
    %98 = vector.extract_strided_slice %1 {offsets = [0, 0, 6], sizes = [4, 8, 1], strides = [1, 1, 1]} : vector<4x8x8xf32> to vector<4x8x1xf32>
    %99 = vector.extract_strided_slice %62 {offsets = [0, 6, 0], sizes = [4, 1, 16], strides = [1, 1, 1]} : vector<4x8x16xf32> to vector<4x1x16xf32>
    %100 = vector.broadcast %98 : vector<4x8x1xf32> to vector<4x8x16xf32>
    %101 = vector.broadcast %99 : vector<4x1x16xf32> to vector<4x8x16xf32>
    %102 = arith.mulf %100, %101 : vector<4x8x16xf32>
    %103 = arith.addf %97, %102 : vector<4x8x16xf32>
    %104 = vector.extract_strided_slice %1 {offsets = [0, 0, 7], sizes = [4, 8, 1], strides = [1, 1, 1]} : vector<4x8x8xf32> to vector<4x8x1xf32>
    %105 = vector.extract_strided_slice %62 {offsets = [0, 7, 0], sizes = [4, 1, 16], strides = [1, 1, 1]} : vector<4x8x16xf32> to vector<4x1x16xf32>
    %106 = vector.broadcast %104 : vector<4x8x1xf32> to vector<4x8x16xf32>
    %107 = vector.broadcast %105 : vector<4x1x16xf32> to vector<4x8x16xf32>
    %108 = arith.mulf %106, %107 : vector<4x8x16xf32>
    %109 = arith.addf %103, %108 : vector<4x8x16xf32>
    %110 = vector.shape_cast %109 : vector<4x8x16xf32> to vector<32x16xf32>
    %c0_12 = arith.constant 0 : index
    %c0_13 = arith.constant 0 : index
    %111 = vector.load %arg6[%c0_12, %c0_13] : memref<1x16xf32, #tpu.memory_space<vmem>>, vector<1x16xf32>
    %112 = vector.broadcast %111 : vector<1x16xf32> to vector<32x16xf32>
    %113 = arith.addf %110, %112 : vector<32x16xf32>
    %cst_14 = arith.constant dense<0.000000e+00> : vector<32xf32>
    %114 = vector.multi_reduction <add>, %113, %cst_14 [1] : vector<32x16xf32> to vector<32xf32>
    %115 = vector.shape_cast %114 : vector<32xf32> to vector<32x1xf32>
    %cst_15 = arith.constant 1.600000e+01 : f32
    %116 = vector.broadcast %cst_15 : f32 to vector<32x1xf32>
    %117 = arith.divf %115, %116 : vector<32x1xf32>
    %118 = vector.broadcast %117 : vector<32x1xf32> to vector<32x16xf32>
    %119 = arith.subf %113, %118 : vector<32x16xf32>
    %120 = arith.mulf %119, %119 : vector<32x16xf32>
    %cst_16 = arith.constant dense<0.000000e+00> : vector<32xf32>
    %121 = vector.multi_reduction <add>, %120, %cst_16 [1] : vector<32x16xf32> to vector<32xf32>
    %122 = vector.shape_cast %121 : vector<32xf32> to vector<32x1xf32>
    %cst_17 = arith.constant 1.500000e+01 : f32
    %123 = vector.broadcast %cst_17 : f32 to vector<32x1xf32>
    %124 = arith.divf %122, %123 : vector<32x1xf32>
    %125 = math.sqrt %124 : vector<32x1xf32>
    %cst_18 = arith.constant 9.99999997E-7 : f32
    %126 = vector.broadcast %cst_18 : f32 to vector<32x1xf32>
    %127 = arith.addf %125, %126 : vector<32x1xf32>
    %128 = tpu.reciprocal %127 {approx = true} : vector<32x1xf32> -> vector<32x1xf32>
    %c0_19 = arith.constant 0 : index
    %c0_20 = arith.constant 0 : index
    %129 = vector.load %arg11[%c0_19, %c0_20] : memref<1x16xf32, #tpu.memory_space<vmem>>, vector<1x16xf32>
    %130 = vector.broadcast %128 : vector<32x1xf32> to vector<32x16xf32>
    %131 = arith.mulf %119, %130 : vector<32x16xf32>
    %132 = vector.broadcast %129 : vector<1x16xf32> to vector<32x16xf32>
    %133 = arith.mulf %132, %131 : vector<32x16xf32>
    %c0_21 = arith.constant 0 : index
    %c0_22 = arith.constant 0 : index
    %134 = vector.load %arg12[%c0_21, %c0_22] : memref<1x16xf32, #tpu.memory_space<vmem>>, vector<1x16xf32>
    %135 = vector.broadcast %134 : vector<1x16xf32> to vector<32x16xf32>
    %136 = arith.addf %133, %135 : vector<32x16xf32>
    %137 = arith.addf %136, %0 : vector<32x16xf32>
    %138 = arith.truncf %137 : vector<32x16xf32> to vector<32x16xbf16>
    %c0_23 = arith.constant 0 : index
    %c0_24 = arith.constant 0 : index
    %139 = vector.load %arg7[%c0_23, %c0_24] : memref<16x32xbf16, #tpu.memory_space<vmem>>, vector<16x32xbf16>
    %cst_25 = arith.constant dense<0.000000e+00> : vector<32x32xf32>
    %140 = tpu.matmul %138, %139, %cst_25 {dimension_numbers = #tpu.dot_dimension_numbers<[1], [0], [0], [1], [0, 0, 1, 1], [], []>} : vector<32x16xbf16>, vector<16x32xbf16>, vector<32x32xf32> -> vector<32x32xf32>
    %c0_26 = arith.constant 0 : index
    %c0_27 = arith.constant 0 : index
    %141 = vector.load %arg8[%c0_26, %c0_27] : memref<1x32xf32, #tpu.memory_space<vmem>>, vector<1x32xf32>
    %142 = vector.broadcast %141 : vector<1x32xf32> to vector<32x32xf32>
    %143 = arith.addf %140, %142 : vector<32x32xf32>
    %cst_28 = arith.constant 0.000000e+00 : f32
    %144 = vector.broadcast %cst_28 : f32 to vector<32x32xf32>
    %145 = arith.maximumf %143, %144 : vector<32x32xf32>
    %146 = arith.truncf %145 : vector<32x32xf32> to vector<32x32xbf16>
    %c0_29 = arith.constant 0 : index
    %c0_30 = arith.constant 0 : index
    %147 = vector.load %arg9[%c0_29, %c0_30] : memref<32x16xbf16, #tpu.memory_space<vmem>>, vector<32x16xbf16>
    %cst_31 = arith.constant dense<0.000000e+00> : vector<32x16xf32>
    %148 = tpu.matmul %146, %147, %cst_31 {dimension_numbers = #tpu.dot_dimension_numbers<[1], [0], [0], [1], [0, 0, 1, 1], [], []>} : vector<32x32xbf16>, vector<32x16xbf16>, vector<32x16xf32> -> vector<32x16xf32>
    %c0_32 = arith.constant 0 : index
    %c0_33 = arith.constant 0 : index
    %149 = vector.load %arg10[%c0_32, %c0_33] : memref<1x16xf32, #tpu.memory_space<vmem>>, vector<1x16xf32>
    %150 = vector.broadcast %149 : vector<1x16xf32> to vector<32x16xf32>
    %151 = arith.addf %148, %150 : vector<32x16xf32>
    %152 = arith.addf %151, %137 : vector<32x16xf32>
    %c0_34 = arith.constant 0 : index
    %c0_35 = arith.constant 0 : index
    %153 = vector.load %arg13[%c0_34, %c0_35] : memref<32x16xf32, #tpu.memory_space<vmem>>, vector<32x16xf32>
    tpu.vector_store %arg13[%c0_34, %c0_35], %152 {strides = array<i32>} : memref<32x16xf32, #tpu.memory_space<vmem>>, vector<32x16xf32>,
    return
  }
  func.func @transform_0(%arg0: i32) -> (i32, i32) {
    %c0_i32 = arith.constant 0 : i32
    %c0_i32_0 = arith.constant 0 : i32
    return %arg0, %c0_i32 : i32, i32
  }
  func.func @transform_1(%arg0: i32) -> (i32, i32, i32) {
    %c0_i32 = arith.constant 0 : i32
    %c0_i32_0 = arith.constant 0 : i32
    %c0_i32_1 = arith.constant 0 : i32
    return %arg0, %c0_i32, %c0_i32_0 : i32, i32, i32
  }
  func.func @transform_2(%arg0: i32) -> (i32, i32) {
    %c0_i32 = arith.constant 0 : i32
    %c0_i32_0 = arith.constant 0 : i32
    %c0_i32_1 = arith.constant 0 : i32
    return %c0_i32, %c0_i32_0 : i32, i32
  }
  func.func @transform_3(%arg0: i32) -> (i32, i32) {
    %c0_i32 = arith.constant 0 : i32
    %c0_i32_0 = arith.constant 0 : i32
    %c0_i32_1 = arith.constant 0 : i32
    return %c0_i32, %c0_i32_0 : i32, i32
  }
  func.func @transform_4(%arg0: i32) -> (i32, i32) {
    %c0_i32 = arith.constant 0 : i32
    %c0_i32_0 = arith.constant 0 : i32
    %c0_i32_1 = arith.constant 0 : i32
    return %c0_i32, %c0_i32_0 : i32, i32
  }
  func.func @transform_5(%arg0: i32) -> (i32, i32) {
    %c0_i32 = arith.constant 0 : i32
    %c0_i32_0 = arith.constant 0 : i32
    %c0_i32_1 = arith.constant 0 : i32
    return %c0_i32, %c0_i32_0 : i32, i32
  }
  func.func @transform_6(%arg0: i32) -> (i32, i32) {
    %c0_i32 = arith.constant 0 : i32
    %c0_i32_0 = arith.constant 0 : i32
    %c0_i32_1 = arith.constant 0 : i32
    return %c0_i32, %c0_i32_0 : i32, i32
  }
  func.func @transform_7(%arg0: i32) -> (i32, i32) {
    %c0_i32 = arith.constant 0 : i32
    %c0_i32_0 = arith.constant 0 : i32
    %c0_i32_1 = arith.constant 0 : i32
    return %c0_i32, %c0_i32_0 : i32, i32
  }
  func.func @transform_8(%arg0: i32) -> (i32, i32) {
    %c0_i32 = arith.constant 0 : i32
    %c0_i32_0 = arith.constant 0 : i32
    %c0_i32_1 = arith.constant 0 : i32
    return %c0_i32, %c0_i32_0 : i32, i32
  }
  func.func @transform_9(%arg0: i32) -> (i32, i32) {
    %c0_i32 = arith.constant 0 : i32
    %c0_i32_0 = arith.constant 0 : i32
    %c0_i32_1 = arith.constant 0 : i32
    return %c0_i32, %c0_i32_0 : i32, i32
  }
  func.func @transform_10(%arg0: i32) -> (i32, i32) {
    %c0_i32 = arith.constant 0 : i32
    %c0_i32_0 = arith.constant 0 : i32
    %c0_i32_1 = arith.constant 0 : i32
    return %c0_i32, %c0_i32_0 : i32, i32
  }
  func.func @transform_11(%arg0: i32) -> (i32, i32) {
    %c0_i32 = arith.constant 0 : i32
    %c0_i32_0 = arith.constant 0 : i32
    %c0_i32_1 = arith.constant 0 : i32
    return %c0_i32, %c0_i32_0 : i32, i32
  }
  func.func @transform_12(%arg0: i32) -> (i32, i32) {
    %c0_i32 = arith.constant 0 : i32
    %c0_i32_0 = arith.constant 0 : i32
    return %arg0, %c0_i32 : i32, i32
  }
}

</mosaic_0001>

<bundles_post_ra>
// kernel: tpu_custom_call.1
= control target key start
LH: loop header
LB: loop body
LE: loop exit
PB: predicated region body
PF: predicated region fallthrough
CT: control target
= control target key end

     0   :  { %v1109_v0 = vmov 1   ;;  %v1110_v2 = vmov 0   ;;  %vm60_vm0 = vcmask 130048   ;;  %v1111_v13 = vmov 2   ;;  %s1604_s1 = inlined_call_operand.vmem [shape: f32[4,8,8], index: 1, kind: input, shape index: {}]   ;;  %s1605_s2 = inlined_call_operand.vmem [shape: bf16[16,32], index: 2, kind: input, shape index: {}]   ;;  %s1606_s0 = inlined_call_operand.vmem [shape: f32[32,16], index: 0, kind: input, shape index: {}]   ;;  %s1607_s4 = inlined_call_operand.vmem [shape: bf16[32,16], index: 4, kind: input, shape index: {}]   ;;  %s1608_s3 = inlined_call_operand.vmem [shape: f32[1,32], index: 3, kind: input, shape index: {}]   ;;  %s1609_s5 = inlined_call_operand.vmem [shape: f32[1,16], index: 5, kind: input, shape index: {}]   ;;  %s1610_s6 = inlined_call_operand.vmem [shape: bf16[16,32], index: 6, kind: input, shape index: {}]   ;;  %s1611_s10 = inlined_call_operand.vmem [shape: f32[1,16], index: 10, kind: input, shape index: {}]   ;;  %s1612_s11 = inlined_call_operand.vmem [shape: f32[1,16], index: 11, kind: input, shape index: {}]   ;;  %s1613_s8 = inlined_call_operand.vmem [shape: bf16[32,16], index: 8, kind: input, shape index: {}]   ;;  %s1614_s7 = inlined_call_operand.vmem [shape: f32[1,32], index: 7, kind: input, shape index: {}]   ;;  %s1615_s9 = inlined_call_operand.vmem [shape: f32[1,16], index: 9, kind: input, shape index: {}]   ;;  %s1616_s12 = inlined_call_operand.vmem [shape: f32[32,16], index: 12, kind: output, shape index: {}]  }
   0x1   :  { %1071 = vset.pattern.permute.xlu1 %v1109_v0  ;;  %v1185_v1 = vld [vmem:[%s1604_s1] sm:$0xff]  ;;  %1070 = vset.pattern.permute.xlu0 %v1110_v2  ;;  %v1194_v4 = vld [vmem:[%s1604_s1 + $0x8] sm:$0xff]  ;;  %v1210_v7 = vld [vmem:[%s1606_s0 + $0x10] sm:$0xff]  ;;  %v1112_v14 = vmov 3   ;;  %v1113_v15 = vmov 4   ;;  %v1114_v16 = vmov 5   ;;  %v136_v43 = vlaneseq }
   0x2   :  { %157 = vperm.xlu1 %1071, %v1185_v1   ;;  %v1087_v3 = vld [vmem:[%s1605_s2] sm:$0xff]   ;;  %118 = vperm.xlu0 %1070, %v1185_v1   ;;  %v1205_v6 = vld [vmem:[%s1606_s0 + $0x8] sm:$0xff]  ;;  %1627 = vst [vmem:[#allocation4_spill] sm:$0xff] %v1210_v7  ;;  %v1215_v8 = vld [vmem:[%s1606_s0 + $0x18] sm:$0xff]  ;;  %v1115_v17 = vmov 6   ;;  %v1116_v18 = vmov 7  }
   0x3   :  { %v1199_v5 = vld [vmem:[%s1606_s0] sm:$0xff]  ;;  %1626 = vst [vmem:[#allocation3_spill] sm:$0xff] %v1205_v6  ;;  %1628 = vst [vmem:[#allocation5_spill] sm:$0xff] %v1215_v8  ;;  %1034 = vmatprep.subr.bf16.mxu0 %v1087_v3  ;;  %v51_v10 = vpack.c.bf16 %v1215_v8, %v1210_v7  ;;  %v49_v11 = vld [vmem:[%s1604_s1 + $0x18] sm:$0xff]  ;;  %v137_v45 = vshrl.u32 %v136_v43, 7  ;;  %vm469_vm1 = vcmask 261120  }
   0x4   :  { %1625 = vst [vmem:[#allocation2_spill] sm:$0xff] %v1199_v5  ;;  %v50_v9 = vpack.c.bf16 %v1205_v6, %v1199_v5  ;;  %1035 = vmatpush3.bf16.msra.mxu0 %v1087_v3  ;;  %v48_v12 = vld [vmem:[%s1604_s1 + $0x10] sm:$0xff]  ;;  %v1088_v19 = vld [vmem:[%s1607_s4 + $0x8] sm:$0xff]   ;;  %v1089_v20 = vld [vmem:[%s1607_s4] sm:$0xff]  }
   0x5   :  { %1040 = vmatprep.subr.bf16.mxu1 %v1088_v19  ;;  %v1299_v48 = vsub.s32 0, %v137_v45  ;;  %v1301_v49 = vsub.s32 1, %v137_v45  ;;  %v1303_v50 = vsub.s32 2, %v137_v45  ;;  %v1305_v51 = vsub.s32 3, %v137_v45 }
   0x6   :  { %161 = vperm.xlu1 %1071, %v1194_v4   ;;  %1036 = vmatprep.mubr.msk.bf16.mxu0 %vm60_vm0, %v50_v9  ;;  %v1307_v52 = vsub.s32 4, %v137_v45  ;;  %v1309_v53 = vsub.s32 5, %v137_v45  ;;  %v1311_v54 = vsub.s32 6, %v137_v45  ;;  %v1313_v55 = vsub.s32 7, %v137_v45 }
   0x7   :  { %123 = vperm.xlu0 %1070, %v1194_v4   ;;  %1037 = vmatmul.mubr.msk.bf16.vlgmr.msra.gmra.mxu0 %vm60_vm0, %v51_v10 }
   0x8   :  { %1041 = vmatpush3.bf16.msra.mxu1 %v1088_v19 }
   0x9   :  { %1042 = vmatprep.subr.bf16.mxu1 %v1089_v20 }
   0xa   :  { %1072 = vset.pattern.permute.xlu1 %v1110_v2 }
   0xb   :  { %133 = vperm.xlu1 %1072, %v49_v11   ;;  %128 = vperm.xlu0 %1070, %v48_v12  }
   0xc   :  { %1043 = vmatpush3.bf16.msra.mxu1 %v1089_v20 }
   0xf   :  { %1074 = vset.pattern.permute.xlu1 %v1109_v0  ;;  %1073 = vset.pattern.permute.xlu0 %v1109_v0 }
  0x10   :  { %169 = vperm.xlu1 %1074, %v49_v11   ;;  %165 = vperm.xlu0 %1073, %v48_v12  }
  0x14   :  { %1075 = vset.pattern.permute.xlu1 %v1111_v13  ;;  %1076 = vset.pattern.permute.xlu0 %v1111_v13 }
  0x15   :  { %197 = vperm.xlu1 %1075, %v1185_v1   ;;  %201 = vperm.xlu0 %1076, %v1194_v4  }
  0x19   :  { %205 = vperm.xlu1 %1075, %v48_v12   ;;  %1077 = vset.pattern.permute.xlu0 %v1112_v14 }
  0x1a   :  { %237 = vperm.xlu0 %1077, %v1185_v1  }
  0x1d   :  { %209 = vperm.xlu1 %1075, %v49_v11  }
  0x1e   :  { %249 = vperm.xlu0 %1077, %v49_v11  }
  0x21   :  { %1078 = vset.pattern.permute.xlu1 %v1112_v14 }
  0x22   :  { %241 = vperm.xlu1 %1078, %v1194_v4   ;;  %1080 = vset.pattern.permute.xlu0 %v1113_v15 }
  0x23   :  { %281 = vperm.xlu0 %1080, %v1194_v4  }
  0x26   :  { %245 = vperm.xlu1 %1078, %v48_v12  }
  0x27   :  { %1081 = vset.pattern.permute.xlu0 %v1114_v16 }
  0x28   :  { %317 = vperm.xlu0 %1081, %v1185_v1  }
  0x2a   :  { %1079 = vset.pattern.permute.xlu1 %v1113_v15 }
  0x2b   :  { %277 = vperm.xlu1 %1079, %v1185_v1  }
  0x2c   :  { %329 = vperm.xlu0 %1081, %v49_v11  }
  0x2f   :  { %285 = vperm.xlu1 %1079, %v48_v12  }
  0x30   :  { %1084 = vset.pattern.permute.xlu0 %v1115_v17 }
  0x31   :  { %361 = vperm.xlu0 %1084, %v1194_v4  }
  0x33   :  { %289 = vperm.xlu1 %1079, %v49_v11  }
  0x35   :  { %1085 = vset.pattern.permute.xlu0 %v1116_v18 }
  0x36   :  { %397 = vperm.xlu0 %1085, %v1185_v1  }
  0x37   :  { %1082 = vset.pattern.permute.xlu1 %v1114_v16 }
  0x38   :  { %321 = vperm.xlu1 %1082, %v1194_v4  }
  0x3a   :  { %409 = vperm.xlu0 %1085, %v49_v11  }
  0x3c   :  { %325 = vperm.xlu1 %1082, %v48_v12  }
  0x40   :  { %1083 = vset.pattern.permute.xlu1 %v1115_v17 }
  0x41   :  { %357 = vperm.xlu1 %1083, %v1185_v1  }
  0x45   :  { %365 = vperm.xlu1 %1083, %v48_v12  }
  0x49   :  { %369 = vperm.xlu1 %1083, %v49_v11  }
  0x4d   :  { %1086 = vset.pattern.permute.xlu1 %v1116_v18 }
  0x4e   :  { %401 = vperm.xlu1 %1086, %v1194_v4  }
  0x52   :  { %405 = vperm.xlu1 %1086, %v48_v12  }
  0x7d   :  { %v1249_v21 = vpop.permute.xlu1 %157  ;;  %v1257_v25 = vpop.permute.xlu0 %118 }
  0x81   :  { %v1251_v22 = vpop.permute.xlu1 %161 }
  0x82   :  { %v1263_v28 = vpop.permute.xlu0 %123 }
  0x86   :  { %v1253_v23 = vpop.permute.xlu1 %133  ;;  %v1267_v30 = vpop.permute.xlu0 %128 }
  0x8b   :  { %v1255_v24 = vpop.permute.xlu1 %169  ;;  %v1271_v32 = vpop.permute.xlu0 %165 }
  0x90   :  { %v1259_v26 = vpop.permute.xlu1 %197  ;;  %v1277_v35 = vpop.permute.xlu0 %201 }
  0x94   :  { %v1261_v27 = vpop.permute.xlu1 %205 }
  0x95   :  { %1629 = vst [vmem:[#allocation6_spill] sm:$0xff] %v1261_v27  ;;  %v1281_v37 = vpop.permute.xlu0 %237 }
  0x98   :  { %v1265_v29 = vpop.permute.xlu1 %209 }
  0x99   :  { %v1285_v39 = vpop.permute.xlu0 %249 }
  0x9d   :  { %v1269_v31 = vpop.permute.xlu1 %241 }
  0x9e   :  { %v1289_v41 = vpop.permute.xlu0 %281 }
  0xa1   :  { %v1273_v33 = vpop.permute.xlu1 %245 }
  0xa2   :  { %1630 = vst [vmem:[#allocation7_spill] sm:$0xff] %v1273_v33 }
  0xa3   :  { %v1293_v44 = vpop.permute.xlu0 %317 }
  0xa6   :  { %v1275_v34 = vpop.permute.xlu1 %277 }
  0xa7   :  { %v1297_v47 = vpop.permute.xlu0 %329 }
  0xaa   :  { %v1279_v36 = vpop.permute.xlu1 %285 }
  0xab   :  { %1631 = vst [vmem:[#allocation8_spill] sm:$0xff] %v1279_v36 }
  0xac   :  { %v1327_v62 = vpop.permute.xlu0 %361 }
  0xae   :  { %v1283_v38 = vpop.permute.xlu1 %289 }
  0xb1   :  { %v1362_v7 = vpop.permute.xlu0 %397 }
  0xb3   :  { %v1287_v40 = vpop.permute.xlu1 %321 }
  0xb7   :  { %v1291_v42 = vpop.permute.xlu1 %325 }
  0xbc   :  { %v1295_v46 = vpop.permute.xlu1 %357 }
  0xc0   :  { %v1315_v56 = vpop.permute.xlu1 %365 }
  0xc1   :  { %1632 = vst [vmem:[#allocation9_spill] sm:$0xff] %v1315_v56 }
  0xc4   :  { %v1351_v18 = vpop.permute.xlu1 %369 }
  0xc7   :  { %v1317_v57 = vpop.f32.mrf.mxu0 }
  0xc8   :  { %v147_v58 = vrot.slane %v1317_v57, %v1299_v48  ;;  %v183_v59 = vrot.slane %v1317_v57, %v1301_v49  ;;  %v223_v60 = vrot.slane %v1317_v57, %v1303_v50  ;;  %v263_v61 = vrot.slane %v1317_v57, %v1305_v51 }
  0xc9   :  { %v1329_v63 = vpop.f32.mrf.mxu0  ;;  %v303_v0 = vrot.slane %v1317_v57, %v1307_v52  ;;  %v343_v2 = vrot.slane %v1317_v57, %v1309_v53  ;;  %v383_v3 = vrot.slane %v1317_v57, %v1311_v54 }
  0xca   :  { %v154_v1 = vmul.f32 %v147_v58, %v1267_v30  ;;  %v139_v9 = vrot.slane %v1329_v63, %v1299_v48  ;;  %v175_v10 = vrot.slane %v1329_v63, %v1301_v49  ;;  %v215_v11 = vrot.slane %v1329_v63, %v1303_v50 }
  0xcb   :  { %v1039_v12 = vpop.f32.mrf.mxu0  ;;  %v190_v13 = vmul.f32 %v183_v59, %v1271_v32  ;;  %v230_v14 = vmul.f32 %v223_v60, %v1261_v27  ;;  %v270_v15 = vmul.f32 %v263_v61, %v1273_v33  ;;  %v310_v20 = vmul.f32 %v303_v0, %v1279_v36 }
  0xcc   :  { %v151_v16 = vrot.slane %v1039_v12, %v1299_v48  ;;  %v187_v17 = vrot.slane %v1039_v12, %v1301_v49  ;;  %v227_v43 = vrot.slane %v1039_v12, %v1303_v50  ;;  %v267_v45 = vrot.slane %v1039_v12, %v1305_v51 }
  0xcd   :  { %v194_v19 = vadd.f32 %v190_v13, %v154_v1  ;;  %v307_v60 = vrot.slane %v1039_v12, %v1307_v52  ;;  %v347_v61 = vrot.slane %v1039_v12, %v1309_v53  ;;  %v1360_v4 = vpop.f32.mrf.mxu0  ;;  %v350_v1 = vmul.f32 %v343_v2, %v1291_v42 }
  0xce   :  { %v155_v58 = vmul.f32 %v151_v16, %v1253_v23  ;;  %v191_v59 = vmul.f32 %v187_v17, %v1255_v24  ;;  %v390_v0 = vmul.f32 %v383_v3, %v1315_v56  ;;  %v231_v13 = vmul.f32 %v227_v43, %v1265_v29 }
  0xcf   :  { %v234_v8 = vadd.f32 %v230_v14, %v194_v19  ;;  %v271_v16 = vmul.f32 %v267_v45, %v1285_v39  ;;  %v311_v17 = vmul.f32 %v307_v60, %v1283_v38  ;;  %v387_v5 = vrot.slane %v1039_v12, %v1311_v54  ;;  %v1379_v45 = vpop.permute.xlu1 %401 }
  0xd0   :  { %v195_v6 = vadd.f32 %v191_v59, %v155_v58  ;;  %v351_v33 = vmul.f32 %v347_v61, %v1297_v47  ;;  %v143_v27 = vrot.slane %v1360_v4, %v1299_v48  ;;  %v179_v2 = vrot.slane %v1360_v4, %v1301_v49 }
  0xd1   :  { %v274_v36 = vadd.f32 %v270_v15, %v234_v8  ;;  %v427_v3 = vrot.slane %v1039_v12, %v1313_v55  ;;  %v219_v19 = vrot.slane %v1360_v4, %v1303_v50  ;;  %v152_v43 = vmul.f32 %v139_v9, %v1257_v25 }
  0xd2   :  { %v235_v14 = vadd.f32 %v231_v13, %v195_v6  ;;  %v153_v8 = vmul.f32 %v143_v27, %v1263_v28  ;;  %v188_v15 = vmul.f32 %v175_v10, %v1249_v21  ;;  %v189_v59 = vmul.f32 %v179_v2, %v1251_v22  ;;  %v1388_v13 = vpop.permute.xlu0 %409 }
  0xd3   :  { %v314_v58 = vadd.f32 %v310_v20, %v274_v36  ;;  %v391_v61 = vmul.f32 %v387_v5, %v1351_v18  ;;  %v228_v6 = vmul.f32 %v215_v11, %v1259_v26  ;;  %v255_v12 = vrot.slane %v1329_v63, %v1305_v51 }
  0xd4   :  { %v275_v60 = vadd.f32 %v271_v16, %v235_v14  ;;  %v192_v9 = vadd.f32 %v188_v15, %v152_v43  ;;  %v193_v56 = vadd.f32 %v189_v59, %v153_v8  ;;  %v229_v36 = vmul.f32 %v219_v19, %v1277_v35 }
  0xd5   :  { %v259_v27 = vrot.slane %v1360_v4, %v1305_v51  ;;  %v354_v10 = vadd.f32 %v350_v1, %v314_v58  ;;  %v295_v16 = vrot.slane %v1329_v63, %v1307_v52  ;;  %v299_v5 = vrot.slane %v1360_v4, %v1307_v52 }
  0xd6   :  { %v315_v20 = vadd.f32 %v311_v17, %v275_v60  ;;  %v232_v11 = vadd.f32 %v228_v6, %v192_v9  ;;  %v233_v2 = vadd.f32 %v229_v36, %v193_v56  ;;  %v268_v14 = vmul.f32 %v255_v12, %v1281_v37  ;;  %v1403_v17 = vpop.permute.xlu1 %405 }
  0xd7   :  { %v269_v43 = vmul.f32 %v259_v27, %v1269_v31  ;;  %v431_v19 = vmul.f32 %v427_v3, %v1388_v13  ;;  %v308_v15 = vmul.f32 %v295_v16, %v1275_v34  ;;  %v335_v1 = vrot.slane %v1329_v63, %v1309_v53 }
  0xd8   :  { %v355_v8 = vadd.f32 %v351_v33, %v315_v20  ;;  %v272_v58 = vadd.f32 %v268_v14, %v232_v11  ;;  %v309_v60 = vmul.f32 %v299_v5, %v1289_v41  ;;  %v339_v56 = vrot.slane %v1360_v4, %v1309_v53 }
  0xd9   :  { %v273_v59 = vadd.f32 %v269_v43, %v233_v2  ;;  %v394_v6 = vadd.f32 %v390_v0, %v354_v10  ;;  %v375_v33 = vrot.slane %v1329_v63, %v1311_v54  ;;  %v379_v3 = vrot.slane %v1360_v4, %v1311_v54 }
  0xda   :  { %v395_v12 = vadd.f32 %v391_v61, %v355_v8  ;;  %v312_v9 = vadd.f32 %v308_v15, %v272_v58  ;;  %v348_v27 = vmul.f32 %v335_v1, %v1293_v44  ;;  %v349_v20 = vmul.f32 %v339_v56, %v1287_v40  ;;  %v1003_v15 = vld [vmem:[%s1608_s3] ss:$0 sm:$0xff] }
  0xdb   :  { %v313_v36 = vadd.f32 %v309_v60, %v273_v59  ;;  %v1633_v16 = vrot.slane %v1317_v57, %v1313_v55  ;;  %v388_v0 = vmul.f32 %v375_v33, %v1295_v46  ;;  %v415_v61 = vrot.slane %v1329_v63, %v1313_v55 }
  0xdc   :  { %v435_v11 = vadd.f32 %v431_v19, %v395_v12  ;;  %v352_v10 = vadd.f32 %v348_v27, %v312_v9  ;;  %v389_v14 = vmul.f32 %v379_v3, %v1327_v62  ;;  %v419_v43 = vrot.slane %v1360_v4, %v1313_v55 }
  0xdd   :  { %v430_v5 = vmul.f32 %v1633_v16, %v1403_v17  ;;  %v353_v2 = vadd.f32 %v349_v20, %v313_v36  ;;  %v428_v19 = vmul.f32 %v415_v61, %v1362_v7 }
  0xde   :  { %v392_v57 = vadd.f32 %v388_v0, %v352_v10  ;;  %v429_v58 = vmul.f32 %v419_v43, %v1379_v45  ;;  %v446_v59 = vadd.f32 %v1003_v15, %v435_v11 }
  0xdf   :  { %v434_v8 = vadd.f32 %v430_v5, %v394_v6  ;;  %v393_v1 = vadd.f32 %v389_v14, %v353_v2 }
  0xe0   :  { %v432_v63 = vadd.f32 %v428_v19, %v392_v57  ;;  %v450_v3 = vmax.f32 %v446_v59, 0.0 }
  0xe1   :  { %v433_v60 = vadd.f32 %v429_v58, %v393_v1  ;;  %v445_v56 = vadd.f32 %v1003_v15, %v434_v8 }
  0xe2   :  { %v443_v12 = vadd.f32 %v1003_v15, %v432_v63 }
  0xe3   :  { %v444_v33 = vadd.f32 %v1003_v15, %v433_v60  ;;  %v449_v6 = vmax.f32 %v445_v56, 0.0 }
  0xe4   :  { %v447_v9 = vmax.f32 %v443_v12, 0.0 }
  0xe5   :  { %v448_v4 = vmax.f32 %v444_v33, 0.0  ;;  %v452_v27 = vpack.c.bf16 %v450_v3, %v449_v6 }
  0xe7   :  { %v451_v36 = vpack.c.bf16 %v448_v4, %v447_v9 }
  0xe9   :  { %1044 = vmatprep.mubr.msk.bf16.mxu1 %vm469_vm1, %v451_v36 }
  0xea   :  { %1045 = vmatmul.mubr.msk.bf16.vlgmr.msra.gmra.mxu1 %vm469_vm1, %v452_v27 }
 0x1aa   :  { %v1431_v20 = vpop.f32.mrf.mxu1 }
 0x1ab   :  { %v536_v61 = vrot.slane %v1431_v20, %v1299_v48  ;;  %v556_v57 = vrot.slane %v1431_v20, %v1301_v49  ;;  %v580_v58 = vrot.slane %v1431_v20, %v1303_v50  ;;  %v604_v59 = vrot.slane %v1431_v20, %v1305_v51 }
 0x1ac   :  { %v510_v16 = vpop.f32.mrf.mxu1 }
 0x1ad   :  { %v528_v5 = vrot.slane %v510_v16, %v1299_v48  ;;  %v548_v11 = vrot.slane %v510_v16, %v1301_v49  ;;  %v572_v0 = vrot.slane %v510_v16, %v1303_v50  ;;  %v596_v2 = vrot.slane %v510_v16, %v1305_v51 }
 0x1ae   :  { %v1438_v10 = vpop.f32.mrf.mxu1  ;;  %v620_v19 = vrot.slane %v510_v16, %v1307_v52  ;;  %v692_v36 = vrot.slane %v510_v16, %v1313_v55 }
 0x1af   :  { %v540_v14 = vrot.slane %v1438_v10, %v1299_v48  ;;  %v560_v43 = vrot.slane %v1438_v10, %v1301_v49  ;;  %v541_v8 = vmul.f32 %v528_v5, %v1257_v25  ;;  %v561_v15 = vmul.f32 %v548_v11, %v1249_v21 }
 0x1b0   :  { %v1449_v1 = vpop.f32.mrf.mxu1  ;;  %v585_v60 = vmul.f32 %v572_v0, %v1259_v26  ;;  %v644_v25 = vrot.slane %v510_v16, %v1309_v53  ;;  %v668_v21 = vrot.slane %v510_v16, %v1311_v54  ;;  %v584_v3 = vrot.slane %v1438_v10, %v1303_v50 }
 0x1b1   :  { %v565_v63 = vadd.f32 %v561_v15, %v541_v8  ;;  %v532_v56 = vrot.slane %v1449_v1, %v1299_v48  ;;  %v544_v12 = vmul.f32 %v540_v14, %v1253_v23  ;;  %v564_v33 = vmul.f32 %v560_v43, %v1255_v24 }
 0x1b2   :  { %v552_v9 = vrot.slane %v1449_v1, %v1301_v49  ;;  %v609_v26 = vmul.f32 %v596_v2, %v1281_v37  ;;  %v608_v6 = vrot.slane %v1438_v10, %v1305_v51  ;;  %v588_v48 = vmul.f32 %v584_v3, %v1265_v29 }
 0x1b3   :  { %v589_v4 = vadd.f32 %v585_v60, %v565_v63  ;;  %v568_v27 = vadd.f32 %v564_v33, %v544_v12  ;;  %v632_v23 = vrot.slane %v1438_v10, %v1307_v52  ;;  %v633_v5 = vmul.f32 %v620_v19, %v1275_v34 }
 0x1b4   :  { %v657_v11 = vmul.f32 %v644_v25, %v1293_v44  ;;  %v681_v49 = vmul.f32 %v668_v21, %v1295_v46  ;;  %v612_v37 = vmul.f32 %v608_v6, %v1285_v39  ;;  %v656_v2 = vrot.slane %v1438_v10, %v1309_v53 }
 0x1b5   :  { %v613_v24 = vadd.f32 %v609_v26, %v589_v4  ;;  %v592_v0 = vadd.f32 %v588_v48, %v568_v27  ;;  %v542_v16 = vmul.f32 %v532_v56, %v1263_v28  ;;  %v562_v29 = vmul.f32 %v552_v9, %v1251_v22  ;;  %v1634_v26 = vld [vmem:[#allocation6_spill] sm:$0xff]  ;;  %v1635_v48 = vld [vmem:[#allocation7_spill] sm:$0xff] }
 0x1b6   :  { %v576_v43 = vrot.slane %v1449_v1, %v1303_v50  ;;  %v600_v34 = vrot.slane %v1449_v1, %v1305_v51  ;;  %v705_v44 = vmul.f32 %v692_v36, %v1362_v7  ;;  %v636_v8 = vmul.f32 %v632_v23, %v1283_v38 }
 0x1b7   :  { %v637_v14 = vadd.f32 %v633_v5, %v613_v24  ;;  %v616_v46 = vadd.f32 %v612_v37, %v592_v0  ;;  %v680_v39 = vrot.slane %v1438_v10, %v1311_v54  ;;  %v566_v19 = vadd.f32 %v562_v29, %v542_v16  ;;  %v1637_v29 = vld [vmem:[#allocation9_spill] sm:$0xff] }
 0x1b8   :  { %v586_v28 = vmul.f32 %v576_v43, %v1277_v35  ;;  %v624_v22 = vrot.slane %v1449_v1, %v1307_v52  ;;  %v660_v50 = vmul.f32 %v656_v2, %v1297_v47  ;;  %v704_v60 = vrot.slane %v1438_v10, %v1313_v55 }
 0x1b9   :  { %v661_v15 = vadd.f32 %v657_v11, %v637_v14  ;;  %v640_v63 = vadd.f32 %v636_v8, %v616_v46  ;;  %v648_v7 = vrot.slane %v1449_v1, %v1309_v53  ;;  %v610_v21 = vmul.f32 %v600_v34, %v1269_v31  ;;  %v1008_v31 = vld [vmem:[%s1609_s5] ss:$0 sm:$0xff] }
 0x1ba   :  { %v590_v25 = vadd.f32 %v586_v28, %v566_v19  ;;  %v543_v56 = vmul.f32 %v536_v61, %v1267_v30  ;;  %v684_v35 = vmul.f32 %v680_v39, %v1351_v18  ;;  %v563_v33 = vmul.f32 %v556_v57, %v1271_v32 }
 0x1bb   :  { %v685_v38 = vadd.f32 %v681_v49, %v661_v15  ;;  %v664_v12 = vadd.f32 %v660_v50, %v640_v63  ;;  %v628_v47 = vrot.slane %v1431_v20, %v1307_v52  ;;  %v634_v10 = vmul.f32 %v624_v22, %v1289_v41  ;;  %v1636_v49 = vld [vmem:[#allocation8_spill] sm:$0xff] }
 0x1bc   :  { %v614_v9 = vadd.f32 %v610_v21, %v590_v25  ;;  %v672_v4 = vrot.slane %v1449_v1, %v1311_v54  ;;  %v708_v61 = vmul.f32 %v704_v60, %v1388_v13  ;;  %v567_v18 = vadd.f32 %v563_v33, %v543_v56 }
 0x1bd   :  { %v709_v3 = vadd.f32 %v705_v44, %v685_v38  ;;  %v688_v30 = vadd.f32 %v684_v35, %v664_v12  ;;  %v587_v32 = vmul.f32 %v580_v58, %v1634_v26  ;;  %v658_v52 = vmul.f32 %v648_v7, %v1287_v40 }
 0x1be   :  { %v638_v6 = vadd.f32 %v634_v10, %v614_v9  ;;  %v696_v41 = vrot.slane %v1449_v1, %v1313_v55  ;;  %v611_v23 = vmul.f32 %v604_v59, %v1635_v48  ;;  %v652_v13 = vrot.slane %v1431_v20, %v1309_v53 }
 0x1bf   :  { %v720_v57 = vadd.f32 %v1008_v31, %v709_v3  ;;  %v712_v36 = vadd.f32 %v708_v61, %v688_v30  ;;  %v591_v27 = vadd.f32 %v587_v32, %v567_v18  ;;  %v682_v5 = vmul.f32 %v672_v4, %v1327_v62  ;;  %v1090_v3 = vld [vmem:[%s1610_s6] sm:$0xff]  }
 0x1c0   :  { %v662_v58 = vadd.f32 %v658_v52, %v638_v6  ;;  %v635_v1 = vmul.f32 %v628_v47, %v1636_v49  ;;  %v676_v0 = vrot.slane %v1431_v20, %v1311_v54  ;;  %v706_v51 = vmul.f32 %v696_v41, %v1379_v45  ;;  %1048 = vmatprep.subr.bf16.mxu0 %v1090_v3 }
 0x1c1   :  { %v724_v24 = vsel %vm60_vm0, %v720_v57, 0.0  ;;  %v723_v40 = vadd.f32 %v1008_v31, %v712_v36  ;;  %v615_v11 = vadd.f32 %v611_v23, %v591_v27  ;;  %v659_v2 = vmul.f32 %v652_v13, %v1291_v42  ;;  %1049 = vmatpush3.bf16.msra.mxu0 %v1090_v3 }
 0x1c2   :  { %725 = vadd.xlane.f32.xlu1 %v724_v24  ;;  %v686_v37 = vadd.f32 %v682_v5, %v662_v58  ;;  %v700_v53 = vrot.slane %v1431_v20, %v1313_v55  ;;  %v683_v43 = vmul.f32 %v676_v0, %v1637_v29  ;;  %v1009_v29 = vld [vmem:[%s1611_s10] ss:$0 sm:$0xff] }
 0x1c3   :  { %v639_v59 = vadd.f32 %v635_v1, %v615_v11  ;;  %v733_v16 = vsel %vm60_vm0, %v723_v40, 0.0 }
 0x1c4   :  { %v710_v62 = vadd.f32 %v706_v51, %v686_v37  ;;  %v707_v54 = vmul.f32 %v700_v53, %v1403_v17 }
 0x1c5   :  { %v663_v14 = vadd.f32 %v659_v2, %v639_v59 }
 0x1c6   :  { %734 = vadd.xlane.f32.xlu1 %v733_v16  ;;  %v721_v34 = vadd.f32 %v1008_v31, %v710_v62 }
 0x1c7   :  { %v687_v44 = vadd.f32 %v683_v43, %v663_v14 }
 0x1c8   :  { %v727_v46 = vsel %vm60_vm0, %v721_v34, 0.0 }
 0x1c9   :  { %728 = vadd.xlane.f32.xlu0 %v727_v46  ;;  %v711_v45 = vadd.f32 %v707_v54, %v687_v44  ;;  %v1010_v44 = vld [vmem:[%s1612_s11] ss:$0 sm:$0xff] }
 0x1cb   :  { %v722_v8 = vadd.f32 %v1008_v31, %v711_v45 }
 0x1cd   :  { %v730_v42 = vsel %vm60_vm0, %v722_v8, 0.0 }
 0x1ce   :  { %731 = vadd.xlane.f32.xlu0 %v730_v42 }
 0x24b   :  { %v726_v55 = vpop.xlane.xlu1 %725 }
 0x24c   :  { %v737_v20 = vmul.f32 0.0625, %v726_v55 }
 0x24e   :  { %v1535_v39 = vsub.f32 %v720_v57, %v737_v20 }
 0x24f   :  { %v735_v15 = vpop.xlane.xlu1 %734 }
 0x250   :  { %v745_v19 = vmul.f32 %v1535_v39, %v1535_v39  ;;  %v740_v28 = vmul.f32 0.0625, %v735_v15  ;;  %v1638_v15 = vld [vmem:[#allocation2_spill] sm:$0xff] }
 0x252   :  { %v749_v22 = vsel %vm60_vm0, %v745_v19, 0.0  ;;  %v729_v17 = vpop.xlane.xlu0 %728  ;;  %v1540_v50 = vsub.f32 %v723_v40, %v740_v28  ;;  %v1639_v28 = vld [vmem:[#allocation3_spill] sm:$0xff] }
 0x253   :  { %750 = vadd.xlane.f32.xlu0 %v749_v22  ;;  %v738_v63 = vmul.f32 0.0625, %v729_v17 }
 0x254   :  { %v748_v56 = vmul.f32 %v1540_v50, %v1540_v50 }
 0x255   :  { %v1542_v60 = vsub.f32 %v721_v34, %v738_v63 }
 0x256   :  { %v758_v33 = vsel %vm60_vm0, %v748_v56, 0.0  ;;  %v1641_v56 = vld [vmem:[#allocation4_spill] sm:$0xff] }
 0x257   :  { %v732_v7 = vpop.xlane.xlu0 %731  ;;  %v746_v38 = vmul.f32 %v1542_v60, %v1542_v60 }
 0x258   :  { %v739_v25 = vmul.f32 0.0625, %v732_v7 }
 0x259   :  { %v752_v21 = vsel %vm60_vm0, %v746_v38, 0.0 }
 0x25a   :  { %v1549_v12 = vsub.f32 %v722_v8, %v739_v25  ;;  %753 = vadd.xlane.f32.xlu1 %v752_v21 }
 0x25c   :  { %v747_v35 = vmul.f32 %v1549_v12, %v1549_v12 }
 0x25e   :  { %759 = vadd.xlane.f32.xlu1 %v758_v33  ;;  %v755_v47 = vsel %vm60_vm0, %v747_v35, 0.0 }
 0x25f   :  { %756 = vadd.xlane.f32.xlu0 %v755_v47 }
 0x2dc   :  { %v751_v9 = vpop.xlane.xlu0 %750 }
 0x2dd   :  { %v762_v10 = vmul.f32 0.06666667, %v751_v9  ;;  %v1011_v9 = vld [vmem:[%s1614_s7] ss:$0 sm:$0xff] }
 0x2df   :  { %1093 = vrsqrt.f32 %v762_v10  ;;  %vm768_vm2 = vcmp.eq.f32.partialorder %v762_v10, inf  ;;  %v771_v6 = vand.u32 2147483648, %v762_v10  ;;  %vm770_vm3 = vcmp.eq.f32.partialorder %v762_v10, 0.0 }
 0x2e3   :  { %v754_v4 = vpop.xlane.xlu1 %753 }
 0x2e4   :  { %v763_v31 = vmul.f32 0.06666667, %v754_v4 }
 0x2e6   :  { %1095 = vrsqrt.f32 %v763_v31  ;;  %vm775_vm4 = vcmp.eq.f32.partialorder %v763_v31, inf  ;;  %v778_v23 = vand.u32 2147483648, %v763_v31  ;;  %vm777_vm5 = vcmp.eq.f32.partialorder %v763_v31, 0.0 }
 0x2e7   :  { %v760_v30 = vpop.xlane.xlu1 %759 }
 0x2e8   :  { %v765_v61 = vmul.f32 0.06666667, %v760_v30  ;;  %v757_v18 = vpop.xlane.xlu0 %756 }
 0x2e9   :  { %v764_v26 = vmul.f32 0.06666667, %v757_v18 }
 0x2ea   :  { %1097 = vrsqrt.f32 %v765_v61  ;;  %vm789_vm6 = vcmp.eq.f32.partialorder %v765_v61, inf  ;;  %vm791_vm7 = vcmp.eq.f32.partialorder %v765_v61, 0.0  ;;  %v792_v49 = vand.u32 2147483648, %v765_v61 }
 0x2eb   :  { %1099 = vrsqrt.f32 %v764_v26  ;;  %vm782_vm8 = vcmp.eq.f32.partialorder %v764_v26, inf  ;;  %v785_v37 = vand.u32 2147483648, %v764_v26  ;;  %vm784_vm9 = vcmp.eq.f32.partialorder %v764_v26, 0.0 }
 0x2ec   :  { %v1094_v32 = vpop.eup %1093 }
 0x2ed   :  { %v767_v57 = vmul.f32 %v1094_v32, %v762_v10 }
 0x2ef   :  { %v769_v52 = vsel %vm768_vm2, %v762_v10, %v767_v57 }
 0x2f0   :  { %v772_v41 = vsel %vm770_vm3, %v771_v6, %v769_v52 }
 0x2f1   :  { %v794_v36 = vadd.f32 1e-06, %v772_v41 }
 0x2f3   :  { %1101 = vrcp.f32 %v794_v36  ;;  %v1096_v27 = vpop.eup %1095  ;;  %v1015_v36 = vld [vmem:[%s1615_s9] ss:$0 sm:$0xff] }
 0x2f4   :  { %v774_v48 = vmul.f32 %v1096_v27, %v763_v31 }
 0x2f6   :  { %v776_v13 = vsel %vm775_vm4, %v763_v31, %v774_v48 }
 0x2f7   :  { %v1098_v24 = vpop.eup %1097  ;;  %v779_v58 = vsel %vm777_vm5, %v778_v23, %v776_v13 }
 0x2f8   :  { %v1100_v5 = vpop.eup %1099  ;;  %v795_v40 = vadd.f32 1e-06, %v779_v58  ;;  %v788_v11 = vmul.f32 %v1098_v24, %v765_v61 }
 0x2f9   :  { %v781_v1 = vmul.f32 %v1100_v5, %v764_v26 }
 0x2fa   :  { %1103 = vrcp.f32 %v795_v40  ;;  %v790_v0 = vsel %vm789_vm6, %v765_v61, %v788_v11 }
 0x2fb   :  { %v793_v51 = vsel %vm791_vm7, %v792_v49, %v790_v0  ;;  %v783_v59 = vsel %vm782_vm8, %v764_v26, %v781_v1 }
 0x2fc   :  { %v797_v2 = vadd.f32 1e-06, %v793_v51  ;;  %v786_v53 = vsel %vm784_vm9, %v785_v37, %v783_v59 }
 0x2fd   :  { %v796_v16 = vadd.f32 1e-06, %v786_v53 }
 0x2fe   :  { %1105 = vrcp.f32 %v797_v2 }
 0x2ff   :  { %1107 = vrcp.f32 %v796_v16 }
 0x300   :  { %v1102_v62 = vpop.eup %1101 }
 0x301   :  { %v803_v14 = vmul.f32 %v1102_v62, %v1535_v39 }
 0x303   :  { %v813_v43 = vmul.f32 %v1009_v29, %v803_v14 }
 0x305   :  { %v824_v45 = vadd.f32 %v1010_v44, %v813_v43 }
 0x307   :  { %v1104_v34 = vpop.eup %1103  ;;  %v828_v19 = vadd.f32 %v824_v45, %v1638_v15 }
 0x308   :  { %v804_v54 = vmul.f32 %v1104_v34, %v1542_v60  ;;  %v1640_v60 = vld [vmem:[#allocation5_spill] sm:$0xff] }
 0x30a   :  { %v814_v46 = vmul.f32 %v1009_v29, %v804_v54 }
 0x30b   :  { %v1106_v8 = vpop.eup %1105 }
 0x30c   :  { %v1108_v42 = vpop.eup %1107  ;;  %v825_v55 = vadd.f32 %v1010_v44, %v814_v46  ;;  %v806_v20 = vmul.f32 %v1106_v8, %v1540_v50  ;;  %v1091_v50 = vld [vmem:[%s1613_s8 + $0x8] sm:$0xff]  }
 0x30d   :  { %v805_v39 = vmul.f32 %v1108_v42, %v1549_v12  ;;  %v1092_v12 = vld [vmem:[%s1613_s8] sm:$0xff]   ;;  %1054 = vmatprep.subr.bf16.mxu1 %v1091_v50 }
 0x30e   :  { %v829_v22 = vadd.f32 %v825_v55, %v1639_v28  ;;  %v816_v17 = vmul.f32 %v1009_v29, %v806_v20  ;;  %1055 = vmatpush3.bf16.msra.mxu1 %v1091_v50 }
 0x30f   :  { %v815_v63 = vmul.f32 %v1009_v29, %v805_v39  ;;  %1056 = vmatprep.subr.bf16.mxu1 %v1092_v12 }
 0x310   :  { %v832_v7 = vpack.c.bf16 %v829_v22, %v828_v19  ;;  %v827_v38 = vadd.f32 %v1010_v44, %v816_v17 }
 0x311   :  { %v826_v25 = vadd.f32 %v1010_v44, %v815_v63 }
 0x312   :  { %1050 = vmatprep.mubr.msk.bf16.mxu0 %vm60_vm0, %v832_v7  ;;  %v831_v21 = vadd.f32 %v827_v38, %v1640_v60  ;;  %1057 = vmatpush3.bf16.msra.mxu1 %v1092_v12 }
 0x313   :  { %v830_v35 = vadd.f32 %v826_v25, %v1641_v56 }
 0x315   :  { %v833_v33 = vpack.c.bf16 %v831_v21, %v830_v35 }
 0x317   :  { %1051 = vmatmul.mubr.msk.bf16.vlgmr.msra.gmra.mxu0 %vm60_vm0, %v833_v33 }
 0x3d7   :  { %v1052_v47 = vpop.f32.mrf.mxu0 }
 0x3d8   :  { %v898_v30 = vadd.f32 %v1052_v47, %v1011_v9 }
 0x3d9   :  { %v889_v3 = vpop.f32.mrf.mxu0 }
 0x3da   :  { %v890_v4 = vadd.f32 %v1011_v9, %v889_v3  ;;  %v906_v6 = vmax.f32 %v898_v30, 0.0 }
 0x3db   :  { %v1053_v10 = vpop.f32.mrf.mxu0 }
 0x3dc   :  { %v901_v31 = vadd.f32 %v1053_v10, %v1011_v9  ;;  %v904_v32 = vmax.f32 %v890_v4, 0.0 }
 0x3dd   :  { %v892_v61 = vpop.f32.mrf.mxu0 }
 0x3de   :  { %v893_v18 = vadd.f32 %v1011_v9, %v892_v61  ;;  %v907_v26 = vmax.f32 %v901_v31, 0.0 }
 0x3e0   :  { %v905_v57 = vmax.f32 %v893_v18, 0.0  ;;  %v909_v41 = vpack.c.bf16 %v907_v26, %v906_v6 }
 0x3e2   :  { %v908_v52 = vpack.c.bf16 %v905_v57, %v904_v32 }
 0x3e4   :  { %1058 = vmatprep.mubr.msk.bf16.mxu1 %vm469_vm1, %v908_v52 }
 0x3e5   :  { %1059 = vmatmul.mubr.msk.bf16.vlgmr.msra.gmra.mxu1 %vm469_vm1, %v909_v41 }
 0x4a5   :  { %v1060_v27 = vpop.f32.mrf.mxu1 }
 0x4a6   :  { %v982_v48 = vadd.f32 %v1060_v27, %v1015_v36 }
 0x4a7   :  { %v973_v23 = vpop.f32.mrf.mxu1 }
 0x4a8   :  { %v990_v13 = vadd.f32 %v982_v48, %v830_v35  ;;  %v974_v24 = vadd.f32 %v1015_v36, %v973_v23 }
 0x4a9   :  { %v1061_v58 = vpop.f32.mrf.mxu1 }
 0x4aa   :  { %994 = vst.msk [vmem:[%s1616_s12 + $0x10] sm:$0xff] %vm60_vm0, %v990_v13  ;;  %v988_v5 = vadd.f32 %v974_v24, %v828_v19  ;;  %v985_v40 = vadd.f32 %v1061_v58, %v1015_v36 }
 0x4ab   :  { %v976_v11 = vpop.f32.mrf.mxu1 }
 0x4ac   :  { %992 = vst.msk [vmem:[%s1616_s12] sm:$0xff] %vm60_vm0, %v988_v5  ;;  %v991_v49 = vadd.f32 %v985_v40, %v831_v21  ;;  %v977_v1 = vadd.f32 %v1015_v36, %v976_v11 }
 0x4ae   :  { %995 = vst.msk [vmem:[%s1616_s12 + $0x18] sm:$0xff] %vm60_vm0, %v991_v49  ;;  %v989_v0 = vadd.f32 %v977_v1, %v829_v22 }
 0x4b0   :  { %993 = vst.msk [vmem:[%s1616_s12 + $0x8] sm:$0xff] %vm60_vm0, %v989_v0 }

</bundles_post_ra>
